<compile_context>
chip_gen: v6e
topology: v6e:2x2x1
jax: 0.10.0
libtpu: 0.0.40
codegen_flags: <defaults>
</compile_context>

<pallas_src>
import jax
import jax.numpy as jnp
from jax.experimental import pallas as pl
from jax.experimental.pallas import tpu as pltpu


_LANES = 128
# Below ~2x this size a single whole-array DMA descriptor is issued; above it
# the copy is split into a few concurrently outstanding HBM->HBM DMAs.
_DEFAULT_MIN_CHUNK_BYTES = 4 * 1024 * 1024
_MAX_OUTSTANDING_DMAS = 4


# ----------------------------- Pallas kernels ------------------------------

def _whole_copy_kernel(x_hbm, o_hbm, sem):
    # Single DMA of the whole activation, HBM -> HBM.
    cp = pltpu.make_async_copy(x_hbm, o_hbm, sem)
    cp.start()
    cp.wait()


def _make_chunked_copy_kernel(row_starts, row_sizes):
    # Issue all chunk DMAs first (each with its own semaphore) so they are
    # outstanding concurrently, then wait on all of them.  Chunk boundaries
    # are static Python ints baked in at trace time.
    n_chunks = len(row_starts)

    def kernel(x_hbm, o_hbm, sems):
        copies = []
        for c in range(n_chunks):
            lo, sz = row_starts[c], row_sizes[c]
            cp = pltpu.make_async_copy(
                x_hbm.at[pl.ds(lo, sz), :],
                o_hbm.at[pl.ds(lo, sz), :],
                sems.at[c],
            )
            cp.start()
            copies.append(cp)
        for cp in copies:
            cp.wait()

    return kernel


# ------------------------------- wrappers -----------------------------------

def _capture_whole_dma(x):
    nbytes = x.size * x.dtype.itemsize
    return pl.pallas_call(
        _whole_copy_kernel,
        out_shape=jax.ShapeDtypeStruct(x.shape, x.dtype),
        in_specs=[pl.BlockSpec(memory_space=pl.ANY)],
        out_specs=pl.BlockSpec(memory_space=pl.ANY),
        scratch_shapes=[pltpu.SemaphoreType.DMA(())],
        cost_estimate=pl.CostEstimate(
            flops=0, transcendentals=0, bytes_accessed=2 * nbytes),
    )(x)


def _capture_chunked_dma(x, min_chunk_bytes, max_outstanding):
    n = x.size
    itemsize = x.dtype.itemsize
    nbytes = n * itemsize
    rows = n // _LANES

    # Dtype-aware sublane-pack granularity (8 rows for 32-bit, 16 for bf16,
    # 32 for 8-bit): chunk *starts* stay HBM-tile aligned; the last chunk ends
    # at the array extent.
    pack = 8 * max(1, 4 // itemsize)

    n_chunks = max(1, min(max_outstanding, nbytes // max(1, min_chunk_bytes)))
    n_chunks = min(n_chunks, max(1, rows // pack))

    # Row-major flatten: free for contiguous default-layout arrays (for exotic
    # layouts XLA may insert a copy outside the kernel).
    x2d = x.reshape(rows, _LANES)

    if n_chunks <= 1:
        return _capture_whole_dma(x2d).reshape(x.shape)

    rows_per = pl.cdiv(rows, n_chunks)
    rows_per = pl.cdiv(rows_per, pack) * pack
    row_starts, row_sizes = [], []
    start = 0
    while start < rows:
        sz = min(rows_per, rows - start)
        row_starts.append(start)
        row_sizes.append(sz)
        start += sz
    n_chunks = len(row_starts)

    kernel = _make_chunked_copy_kernel(tuple(row_starts), tuple(row_sizes))
    y2d = pl.pallas_call(
        kernel,
        out_shape=jax.ShapeDtypeStruct((rows, _LANES), x.dtype),
        in_specs=[pl.BlockSpec(memory_space=pl.ANY)],
        out_specs=pl.BlockSpec(memory_space=pl.ANY),
        scratch_shapes=[pltpu.SemaphoreType.DMA((n_chunks,))],
        cost_estimate=pl.CostEstimate(
            flops=0, transcendentals=0, bytes_accessed=2 * nbytes),
    )(x2d)
    return y2d.reshape(x.shape)


def pallas_capture(x, *, min_chunk_bytes=_DEFAULT_MIN_CHUNK_BYTES,
                   max_outstanding=_MAX_OUTSTANDING_DMAS):
    """Materialize a snapshot copy of an activation tensor of any shape."""
    x = jnp.asarray(x)
    n = x.size
    if n == 0:
        return x
    nbytes = n * x.dtype.itemsize
    if (n % _LANES != 0) or (nbytes < 2 * min_chunk_bytes):
        # Ragged or small: one whole-array DMA, exactly one HBM round trip.
        return _capture_whole_dma(x)
    return _capture_chunked_dma(x, min_chunk_bytes, max_outstanding)


# --------------------------- Module equivalent -----------------------------

class ActivationCapturer:
    """JAX/Pallas analogue of the PyTorch forward-hook ActivationCapturer.

    Training mode: stores the activation by reference (zero-copy aliasing —
    JAX arrays are immutable, matching PyTorch's no-copy hook semantics).
    Eval mode: applies stop_gradient (detach); if `materialize=True`, the
    activation is also snapshotted with the Pallas HBM->HBM copy so the
    captured value is decoupled from later donation/aliasing of the source.
    """

    def __init__(self, layer, capture_input=False, materialize=True):
        self.layer = layer              # anything with a `.training` bool attr
        self.capture_input = capture_input
        self.materialize = materialize
        self.captured = None

    def __call__(self, module, input, output):
        return self.forward(module, input, output)

    def forward(self, module, input, output):
        src = input if self.capture_input else output
        if getattr(self.layer, "training", False):
            # PyTorch stores a reference here; so do we (no kernel launch).
            self.captured = src
        else:
            cap = pallas_capture(src) if self.materialize else src
            self.captured = jax.lax.stop_gradient(cap)   # .detach() equivalent
        return self.captured


class _DummyLayer:
    def __init__(self, training=False):
        self.training = training


# --------------------------------- main ------------------------------------

if __name__ == "__main__":
    key = jax.random.PRNGKey(0)
    k_in, k_out, k_big, k_rag, k_bf16 = jax.random.split(key, 5)

    # NCHW activations, small shapes (module demo).
    x_input = jax.random.normal(k_in, (2, 4, 16, 16), dtype=jnp.float32)
    x_output = jax.random.normal(k_out, (2, 4, 16, 16), dtype=jnp.float32)

    layer = _DummyLayer(training=False)

    # Capture the layer's output (capture_input=False), eval mode -> detached.
    cap_out = ActivationCapturer(layer, capture_input=False)
    captured_out = jax.block_until_ready(cap_out.forward(layer, x_input, x_output))
    assert captured_out.shape == x_output.shape
    assert jnp.array_equal(captured_out, x_output)

    # Capture the layer's input (capture_input=True).
    cap_in = ActivationCapturer(layer, capture_input=True)
    captured_in = jax.block_until_ready(cap_in.forward(layer, x_input, x_output))
    assert jnp.array_equal(captured_in, x_input)

    # Training mode: zero-copy aliasing fast path (no kernel launch).
    train_layer = _DummyLayer(training=True)
    cap_train = ActivationCapturer(train_layer, capture_input=False)
    captured_train = cap_train.forward(train_layer, x_input, x_output)
    assert captured_train is x_output

    # Exercise the chunked HBM->HBM DMA path (4 outstanding DMAs), f32:
    # rows = 1088, pack = 8 -> chunks of 272 rows each.
    x_big = jax.random.normal(k_big, (2, 4, 136, 128), dtype=jnp.float32)
    y_big = jax.block_until_ready(pallas_capture(x_big, min_chunk_bytes=64 * 1024))
    assert jnp.array_equal(y_big, x_big)

    # Exercise bf16 (16-row sublane-pack-aligned chunk starts).
    x_bf16 = jax.random.normal(k_bf16, (2, 4, 64, 128), dtype=jnp.bfloat16)
    y_bf16 = jax.block_until_ready(pallas_capture(x_bf16, min_chunk_bytes=32 * 1024))
    assert jnp.array_equal(y_bf16, x_bf16)

    # Exercise the ragged (element count not a multiple of 128) whole-DMA path.
    x_ragged = jax.random.normal(k_rag, (3, 5, 7), dtype=jnp.float32)
    y_ragged = jax.block_until_ready(pallas_capture(x_ragged))
    assert jnp.array_equal(y_ragged, x_ragged)

    print("KERNEL_OK")
</pallas_src>

<mosaic_0001>
module attributes {stable_mosaic.version = 11 : i64} {
  func.func @_whole_copy_kernel(%arg0: memref<2x4x16x16xf32, #tpu.memory_space<any>>, %arg1: memref<2x4x16x16xf32, #tpu.memory_space<any>>, %arg2: memref<!tpu.dma_semaphore, #tpu.memory_space<semaphore_mem>>) attributes {dimension_semantics = [], scalar_prefetch = 0 : i64, scratch_operands = 1 : i64, tpu.core_type = #tpu.core_type<tc>} {
    tpu.enqueue_dma source(%arg0 : memref<2x4x16x16xf32, #tpu.memory_space<any>>) target(%arg1 : memref<2x4x16x16xf32, #tpu.memory_space<any>>) target_semaphore(%arg2 : memref<!tpu.dma_semaphore, #tpu.memory_space<semaphore_mem>>)
    tpu.wait_dma2 semaphore(%arg2 : memref<!tpu.dma_semaphore, #tpu.memory_space<semaphore_mem>>) src(%arg0 : memref<2x4x16x16xf32, #tpu.memory_space<any>>) dst(%arg1 : memref<2x4x16x16xf32, #tpu.memory_space<any>>)
    return
  }
}

</mosaic_0001>

<bundles_post_ra>
// kernel: tpu_custom_call.1
= control target key start
LH: loop header
LB: loop body
LE: loop exit
PB: predicated region body
PF: predicated region fallthrough
CT: control target
= control target key end

     0   :  { %s30_s6 = smov [#allocation2]   ;;  %s31_s7 = smov 131072   ;;  %s49_s0 = inlined_call_operand.hbm [shape: f32[2,4,16,16], index: 0, kind: input, shape index: {}]   ;;  %s50_s1 = inlined_call_operand.hbm [shape: f32[2,4,16,16], index: 1, kind: output, shape index: {}]  }
   0x1   :  { %s32_s8 = smov 0  }
   0x2   :  { %12 = dma.general %s49_s0, 2048, %s50_s1, %s30_s6, %s31_s7, [#allocation4], %s32_s8, 0  }
   0x3   :  { %28 = dma.done.wait [#allocation2], 2048 }
   0x4   :  { %29 = vsyncadd [#allocation2], 4294965248 }
   0x5   :  { %18 = vsyncmov [#allocation2] }
   0x8   :  { %s19_s13 = vpop.sfrf %18 }
   0x9   :  { %p24_p0 = scmp.ne.s32.totalorder %s19_s13, 0 }
   0xb   :  { %23 = shalt.err (%p24_p0)  }

</bundles_post_ra>
